<compile_context>
chip_gen: v6e
topology: v6e:2x2x1
jax: 0.10.0
libtpu: 0.0.40
codegen_flags: <defaults>
</compile_context>

<pallas_src>
import jax
import jax.numpy as jnp
from jax import lax
from jax.experimental import pallas as pl
from jax.experimental.pallas import tpu as pltpu

N_FEATURE = 150
N_HIDDEN = 30
N_OUTPUT = 3
C_OUT = 5           # Conv1d out_channels
L = 60              # input length; C_OUT * (L // 2) == N_FEATURE
L_POOL = L // 2
SEG = 128           # lane-aligned per-segment width in the fused matmul
N_SEG = (C_OUT + 1) // 2   # 2 conv channels interleaved per 128-lane segment -> 3


def _round_up(n, m):
    return (n + m - 1) // m * m


def net_kernel(x_ref, cw_ref, cb_ref, wf_ref, bh_ref, wp_ref, bp_ref, out_ref):
    """One batch tile of the Net forward.

    x_ref   : (TM, SEG)         f32 VMEM  input tile, lanes [L,SEG) are zero
    cw_ref  : (5, 3)            f32 SMEM  Conv1d weight (out_ch, k), in_ch == 1
    cb_ref  : (5,)              f32 SMEM  Conv1d bias
    wf_ref  : (N_SEG*SEG, 30)   f32 VMEM  hidden weight with pool compaction,
                                          flatten order, pad-lane discard and the
                                          even/odd channel interleave folded in
    bh_ref  : (1, 30)           f32 VMEM
    wp_ref  : (30, 3)           f32 VMEM
    bp_ref  : (1, 3)            f32 VMEM
    out_ref : (TM, 3)           f32
    """
    x = x_ref[...]                                       # (TM, SEG), zero-padded
    tm = x.shape[0]

    # Even-lane mask, built once (hoisted out of the unrolled channel loop).
    lane = lax.broadcasted_iota(jnp.int32, (tm, SEG), 1)
    even_lane = (lane & 1) == 0

    # Neighbour shifts on the XLU; pad lanes are zero so the wrap-around lanes
    # realize the conv's zero padding for free.
    xm1 = pltpu.roll(x, 1, 1)         # x[t-1]; lane 0   <- x[SEG-1] == 0 (pad)
    xp1 = pltpu.roll(x, SEG - 1, 1)   # x[t+1]; lane L-1 <- x[L]     == 0 (pad)

    def conv_relu_pool(c):
        conv_c = (cw_ref[c, 0] * xm1 + cw_ref[c, 1] * x + cw_ref[c, 2] * xp1
                  + cb_ref[c])        # Conv1d(1->5, k=3, pad=1), channel c
        r = jnp.maximum(conv_c, 0.0)  # ReLU
        # MaxPool1d(2): even lane 2i holds max(r[2i], r[2i+1]); other lanes are
        # discarded by the zero rows folded into wf.
        return jnp.maximum(r, pltpu.roll(r, SEG - 1, 1))

    # Per-segment accumulated dots: two conv channels interleaved per 128-lane
    # segment (even lanes = channel 2s, odd lanes = channel 2s+1 shifted by one
    # lane).  acc += (TM,128) @ (128,30); static wf slices are free.
    acc = jnp.zeros((tm, N_HIDDEN), jnp.float32)
    for s in range(N_SEG):            # static unroll (3 segments)
        seg = conv_relu_pool(2 * s)
        if 2 * s + 1 < C_OUT:
            mp_odd = conv_relu_pool(2 * s + 1)
            # lane 2i+1 <- mp_odd[2i]; lane-0 wrap lands on an even lane and is
            # discarded by the select.
            seg = jnp.where(even_lane, seg, pltpu.roll(mp_odd, 1, 1))
        acc = acc + jnp.dot(seg, wf_ref[s * SEG:(s + 1) * SEG, :],
                            preferred_element_type=jnp.float32)

    h = jnp.maximum(acc + bh_ref[...], 0.0)              # Linear(150,30) + ReLU
    out_ref[...] = (jnp.dot(h, wp_ref[...], preferred_element_type=jnp.float32)
                    + bp_ref[...])                       # Linear(30,3)


def net_forward(x, params, *, tm=2048):
    """x: (B, 1, L) f32 -> (B, 3) f32."""
    cw, cb, wh, bh, wp, bp = params
    B = x.shape[0]
    x2d = x.reshape(B, L).astype(jnp.float32)

    # Batch tile: multiple of 8, capped at `tm`, and capped at ~B/2 so the grid
    # has >= 2 steps whenever B > 8 (both v7x TensorCores get work).
    tm_split = _round_up(max(1, -(-B // 2)), 8)
    TM = max(8, min(tm, tm_split, _round_up(B, 8)))
    B_pad = _round_up(B, TM)
    grid = (B_pad // TM,)

    # Host-side zero pad: batch -> B_pad rows, lanes -> 128 (zeros, so the
    # in-kernel roll wrap-around stays a valid conv zero pad).
    x_pad = jnp.pad(x2d, ((0, B_pad - B), (0, SEG - L)))

    # Fold MaxPool compaction + flatten order + pad-lane discard + even/odd
    # channel interleave into the hidden weight, once, at trace time.
    #   flatten feature f = c*30 + i  ->  segment s = c//2,
    #   lane 2i (c even) or lane 2i+1 (c odd) of that segment.
    whT = wh.T.astype(jnp.float32).reshape(C_OUT, L_POOL, N_HIDDEN)
    wf = jnp.zeros((N_SEG, SEG, N_HIDDEN), jnp.float32)
    for s in range(N_SEG):
        wf = wf.at[s, 0:L:2, :].set(whT[2 * s])
        if 2 * s + 1 < C_OUT:
            wf = wf.at[s, 1:L:2, :].set(whT[2 * s + 1])
    wf = wf.reshape(N_SEG * SEG, N_HIDDEN)               # (384, 30)

    cw2 = cw[:, 0, :].astype(jnp.float32)                # (5, 3)
    cb1 = cb.astype(jnp.float32)                         # (5,)
    bh2 = bh.reshape(1, N_HIDDEN).astype(jnp.float32)
    wp_t = wp.T.astype(jnp.float32)                      # (30, 3)
    bp2 = bp.reshape(1, N_OUTPUT).astype(jnp.float32)

    vmem = pl.BlockSpec(memory_space=pltpu.MemorySpace.VMEM)
    smem = pl.BlockSpec(memory_space=pltpu.MemorySpace.SMEM)

    cost = pl.CostEstimate(
        flops=2 * B_pad * (N_SEG * SEG * N_HIDDEN + N_HIDDEN * N_OUTPUT),
        transcendentals=0,
        bytes_accessed=4 * (B_pad * (SEG + N_OUTPUT)
                            + N_SEG * SEG * N_HIDDEN + N_HIDDEN * N_OUTPUT),
    )

    out = pl.pallas_call(
        net_kernel,
        out_shape=jax.ShapeDtypeStruct((B_pad, N_OUTPUT), jnp.float32),
        grid=grid,
        in_specs=[
            pl.BlockSpec((TM, SEG), lambda i: (i, 0)),   # x: pipelined batch tiles
            smem,                                        # conv weight (scalars)
            smem,                                        # conv bias   (scalars)
            vmem,                                        # folded hidden weight
            vmem,                                        # hidden bias
            vmem,                                        # predict weight
            vmem,                                        # predict bias
        ],
        out_specs=pl.BlockSpec((TM, N_OUTPUT), lambda i: (i, 0)),
        compiler_params=pltpu.CompilerParams(
            dimension_semantics=("parallel",),           # megacore / v7x 2 TCs
            vmem_limit_bytes=32 * 1024 * 1024,           # v5e scoped default is ~16 MiB
        ),
        cost_estimate=cost,
    )(x_pad, cw2, cb1, wf, bh2, wp_t, bp2)
    return out[:B]


def init_params(key):
    """Deterministic PyTorch-style (uniform +/- 1/sqrt(fan_in)) init."""
    ks = jax.random.split(key, 6)

    def u(k, shape, fan_in):
        bound = 1.0 / jnp.sqrt(float(fan_in))
        return jax.random.uniform(k, shape, jnp.float32, -bound, bound)

    cw = u(ks[0], (C_OUT, 1, 3), 3)                       # Conv1d weight
    cb = u(ks[1], (C_OUT,), 3)                            # Conv1d bias
    wh = u(ks[2], (N_HIDDEN, N_FEATURE), N_FEATURE)       # Linear(150, 30)
    bh = u(ks[3], (N_HIDDEN,), N_FEATURE)
    wp = u(ks[4], (N_OUTPUT, N_HIDDEN), N_HIDDEN)         # Linear(30, 3)
    bp = u(ks[5], (N_OUTPUT,), N_HIDDEN)
    return cw, cb, wh, bh, wp, bp


def ref_forward(x, params):
    """Plain-JAX reference matching the PyTorch forward exactly."""
    cw, cb, wh, bh, wp, bp = params
    B = x.shape[0]
    xpad = jnp.pad(x, ((0, 0), (0, 0), (1, 1)))[:, 0, :]          # (B, L+2)
    conv = (cw[:, 0, 0][None, :, None] * xpad[:, None, 0:L]
            + cw[:, 0, 1][None, :, None] * xpad[:, None, 1:L + 1]
            + cw[:, 0, 2][None, :, None] * xpad[:, None, 2:L + 2]
            + cb[None, :, None])                                  # (B, 5, L)
    r = jnp.maximum(conv, 0.0)
    pooled = r.reshape(B, C_OUT, L_POOL, 2).max(axis=-1)          # MaxPool1d(2)
    flat = pooled.reshape(B, N_FEATURE)                           # x.view(B, -1)
    h = jnp.maximum(flat @ wh.T + bh, 0.0)
    return h @ wp.T + bp


if __name__ == "__main__":
    key = jax.random.PRNGKey(0)
    kx, kp = jax.random.split(key)
    params = init_params(kp)

    # Small batch (exercises the batch-padding path: 2 -> one 8-row tile).
    B = 2
    x = jax.random.normal(kx, (B, 1, L), dtype=jnp.float32)       # (batch, 1, 60)
    out = jax.block_until_ready(net_forward(x, params))
    expected = ref_forward(x, params)
    assert out.shape == (B, N_OUTPUT)
    assert jnp.allclose(out, expected, atol=1e-4, rtol=1e-4), (out, expected)

    # Larger batch with a small tile to exercise the multi-step batch grid.
    B2 = 20
    x2 = jax.random.normal(jax.random.PRNGKey(1), (B2, 1, L), dtype=jnp.float32)
    out2 = jax.block_until_ready(net_forward(x2, params, tm=8))
    expected2 = ref_forward(x2, params)
    assert jnp.allclose(out2, expected2, atol=1e-4, rtol=1e-4), (out2, expected2)

    # Default tiling path (TM capped at ~B/2 so the grid has >= 2 steps).
    out3 = jax.block_until_ready(net_forward(x2, params))
    assert jnp.allclose(out3, expected2, atol=1e-4, rtol=1e-4), (out3, expected2)

    print("KERNEL_OK")
</pallas_src>

<mosaic_0001>
module attributes {stable_mosaic.version = 11 : i64} {
  func.func @net_kernel(%arg0: i32, %arg1: memref<8x128xf32, #tpu.memory_space<vmem>>, %arg2: memref<5x3xf32, #tpu.memory_space<smem>>, %arg3: memref<5xf32, #tpu.memory_space<smem>>, %arg4: memref<384x30xf32, #tpu.memory_space<vmem>>, %arg5: memref<1x30xf32, #tpu.memory_space<vmem>>, %arg6: memref<30x3xf32, #tpu.memory_space<vmem>>, %arg7: memref<1x3xf32, #tpu.memory_space<vmem>>, %arg8: memref<8x3xf32, #tpu.memory_space<vmem>>) attributes {dimension_semantics = [#tpu.dimension_semantics<parallel>], iteration_bounds = array<i64: 1>, scalar_prefetch = 0 : i64, scratch_operands = 0 : i64, tpu.core_type = #tpu.core_type<tc>, window_params = [{transform_indices = @transform_0, window_bounds = array<i64: 8, 128>}, {transform_indices = @transform_1, window_bounds = array<i64: 5, 3>}, {transform_indices = @transform_2, window_bounds = array<i64: 5>}, {pipeline_mode = #tpu.pipeline_mode<synchronous>, transform_indices = @transform_3, window_bounds = array<i64: 384, 30>}, {pipeline_mode = #tpu.pipeline_mode<synchronous>, transform_indices = @transform_4, window_bounds = array<i64: 1, 30>}, {pipeline_mode = #tpu.pipeline_mode<synchronous>, transform_indices = @transform_5, window_bounds = array<i64: 30, 3>}, {pipeline_mode = #tpu.pipeline_mode<synchronous>, transform_indices = @transform_6, window_bounds = array<i64: 1, 3>}, {transform_indices = @transform_7, window_bounds = array<i64: 8, 3>}]} {
    %c0 = arith.constant 0 : index
    %c0_0 = arith.constant 0 : index
    %0 = vector.load %arg1[%c0, %c0_0] : memref<8x128xf32, #tpu.memory_space<vmem>>, vector<8x128xf32>
    %1 = tpu.iota {dimensions = array<i32: 1>} : vector<8x128xi32>
    %c1_i32 = arith.constant 1 : i32
    %2 = vector.broadcast %c1_i32 : i32 to vector<8x128xi32>
    %3 = arith.andi %1, %2 : vector<8x128xi32>
    %c0_i32 = arith.constant 0 : i32
    %4 = vector.broadcast %c0_i32 : i32 to vector<8x128xi32>
    %5 = arith.cmpi eq, %3, %4 : vector<8x128xi32>
    %c1_i32_1 = arith.constant 1 : i32
    %6 = tpu.dynamic_rotate %0 by %c1_i32_1 dim 1 : vector<8x128xf32>, i32 -> vector<8x128xf32>
    %c127_i32 = arith.constant 127 : i32
    %7 = tpu.dynamic_rotate %0 by %c127_i32 dim 1 : vector<8x128xf32>, i32 -> vector<8x128xf32>
    %cst = arith.constant 0.000000e+00 : f32
    %8 = vector.broadcast %cst : f32 to vector<8x30xf32>
    %c0_2 = arith.constant 0 : index
    %c0_3 = arith.constant 0 : index
    %9 = memref.load %arg2[%c0_2, %c0_3] : memref<5x3xf32, #tpu.memory_space<smem>>
    %10 = vector.broadcast %9 : f32 to vector<8x128xf32>
    %11 = arith.mulf %10, %6 : vector<8x128xf32>
    %c0_4 = arith.constant 0 : index
    %c1 = arith.constant 1 : index
    %12 = memref.load %arg2[%c0_4, %c1] : memref<5x3xf32, #tpu.memory_space<smem>>
    %13 = vector.broadcast %12 : f32 to vector<8x128xf32>
    %14 = arith.mulf %13, %0 : vector<8x128xf32>
    %15 = arith.addf %11, %14 : vector<8x128xf32>
    %c0_5 = arith.constant 0 : index
    %c2 = arith.constant 2 : index
    %16 = memref.load %arg2[%c0_5, %c2] : memref<5x3xf32, #tpu.memory_space<smem>>
    %17 = vector.broadcast %16 : f32 to vector<8x128xf32>
    %18 = arith.mulf %17, %7 : vector<8x128xf32>
    %19 = arith.addf %15, %18 : vector<8x128xf32>
    %c0_6 = arith.constant 0 : index
    %20 = memref.load %arg3[%c0_6] : memref<5xf32, #tpu.memory_space<smem>>
    %21 = vector.broadcast %20 : f32 to vector<8x128xf32>
    %22 = arith.addf %19, %21 : vector<8x128xf32>
    %cst_7 = arith.constant 0.000000e+00 : f32
    %23 = vector.broadcast %cst_7 : f32 to vector<8x128xf32>
    %24 = arith.maximumf %22, %23 : vector<8x128xf32>
    %c127_i32_8 = arith.constant 127 : i32
    %25 = tpu.dynamic_rotate %24 by %c127_i32_8 dim 1 : vector<8x128xf32>, i32 -> vector<8x128xf32>
    %26 = arith.maximumf %24, %25 : vector<8x128xf32>
    %c1_9 = arith.constant 1 : index
    %c0_10 = arith.constant 0 : index
    %27 = memref.load %arg2[%c1_9, %c0_10] : memref<5x3xf32, #tpu.memory_space<smem>>
    %28 = vector.broadcast %27 : f32 to vector<8x128xf32>
    %29 = arith.mulf %28, %6 : vector<8x128xf32>
    %c1_11 = arith.constant 1 : index
    %c1_12 = arith.constant 1 : index
    %30 = memref.load %arg2[%c1_11, %c1_12] : memref<5x3xf32, #tpu.memory_space<smem>>
    %31 = vector.broadcast %30 : f32 to vector<8x128xf32>
    %32 = arith.mulf %31, %0 : vector<8x128xf32>
    %33 = arith.addf %29, %32 : vector<8x128xf32>
    %c1_13 = arith.constant 1 : index
    %c2_14 = arith.constant 2 : index
    %34 = memref.load %arg2[%c1_13, %c2_14] : memref<5x3xf32, #tpu.memory_space<smem>>
    %35 = vector.broadcast %34 : f32 to vector<8x128xf32>
    %36 = arith.mulf %35, %7 : vector<8x128xf32>
    %37 = arith.addf %33, %36 : vector<8x128xf32>
    %c1_15 = arith.constant 1 : index
    %38 = memref.load %arg3[%c1_15] : memref<5xf32, #tpu.memory_space<smem>>
    %39 = vector.broadcast %38 : f32 to vector<8x128xf32>
    %40 = arith.addf %37, %39 : vector<8x128xf32>
    %cst_16 = arith.constant 0.000000e+00 : f32
    %41 = vector.broadcast %cst_16 : f32 to vector<8x128xf32>
    %42 = arith.maximumf %40, %41 : vector<8x128xf32>
    %c127_i32_17 = arith.constant 127 : i32
    %43 = tpu.dynamic_rotate %42 by %c127_i32_17 dim 1 : vector<8x128xf32>, i32 -> vector<8x128xf32>
    %44 = arith.maximumf %42, %43 : vector<8x128xf32>
    %c1_i32_18 = arith.constant 1 : i32
    %45 = tpu.dynamic_rotate %44 by %c1_i32_18 dim 1 : vector<8x128xf32>, i32 -> vector<8x128xf32>
    %46 = arith.select %5, %26, %45 : vector<8x128xi1>, vector<8x128xf32>
    %c0_19 = arith.constant 0 : index
    %c0_20 = arith.constant 0 : index
    %47 = vector.load %arg4[%c0_19, %c0_20] : memref<384x30xf32, #tpu.memory_space<vmem>>, vector<128x30xf32>
    %cst_21 = arith.constant dense<0.000000e+00> : vector<8x30xf32>
    %48 = tpu.matmul %46, %47, %cst_21 {dimension_numbers = #tpu.dot_dimension_numbers<[1], [0], [0], [1], [0, 0, 1, 1], [], []>} : vector<8x128xf32>, vector<128x30xf32>, vector<8x30xf32> -> vector<8x30xf32>
    %49 = arith.addf %8, %48 : vector<8x30xf32>
    %c2_22 = arith.constant 2 : index
    %c0_23 = arith.constant 0 : index
    %50 = memref.load %arg2[%c2_22, %c0_23] : memref<5x3xf32, #tpu.memory_space<smem>>
    %51 = vector.broadcast %50 : f32 to vector<8x128xf32>
    %52 = arith.mulf %51, %6 : vector<8x128xf32>
    %c2_24 = arith.constant 2 : index
    %c1_25 = arith.constant 1 : index
    %53 = memref.load %arg2[%c2_24, %c1_25] : memref<5x3xf32, #tpu.memory_space<smem>>
    %54 = vector.broadcast %53 : f32 to vector<8x128xf32>
    %55 = arith.mulf %54, %0 : vector<8x128xf32>
    %56 = arith.addf %52, %55 : vector<8x128xf32>
    %c2_26 = arith.constant 2 : index
    %c2_27 = arith.constant 2 : index
    %57 = memref.load %arg2[%c2_26, %c2_27] : memref<5x3xf32, #tpu.memory_space<smem>>
    %58 = vector.broadcast %57 : f32 to vector<8x128xf32>
    %59 = arith.mulf %58, %7 : vector<8x128xf32>
    %60 = arith.addf %56, %59 : vector<8x128xf32>
    %c2_28 = arith.constant 2 : index
    %61 = memref.load %arg3[%c2_28] : memref<5xf32, #tpu.memory_space<smem>>
    %62 = vector.broadcast %61 : f32 to vector<8x128xf32>
    %63 = arith.addf %60, %62 : vector<8x128xf32>
    %cst_29 = arith.constant 0.000000e+00 : f32
    %64 = vector.broadcast %cst_29 : f32 to vector<8x128xf32>
    %65 = arith.maximumf %63, %64 : vector<8x128xf32>
    %c127_i32_30 = arith.constant 127 : i32
    %66 = tpu.dynamic_rotate %65 by %c127_i32_30 dim 1 : vector<8x128xf32>, i32 -> vector<8x128xf32>
    %67 = arith.maximumf %65, %66 : vector<8x128xf32>
    %c3 = arith.constant 3 : index
    %c0_31 = arith.constant 0 : index
    %68 = memref.load %arg2[%c3, %c0_31] : memref<5x3xf32, #tpu.memory_space<smem>>
    %69 = vector.broadcast %68 : f32 to vector<8x128xf32>
    %70 = arith.mulf %69, %6 : vector<8x128xf32>
    %c3_32 = arith.constant 3 : index
    %c1_33 = arith.constant 1 : index
    %71 = memref.load %arg2[%c3_32, %c1_33] : memref<5x3xf32, #tpu.memory_space<smem>>
    %72 = vector.broadcast %71 : f32 to vector<8x128xf32>
    %73 = arith.mulf %72, %0 : vector<8x128xf32>
    %74 = arith.addf %70, %73 : vector<8x128xf32>
    %c3_34 = arith.constant 3 : index
    %c2_35 = arith.constant 2 : index
    %75 = memref.load %arg2[%c3_34, %c2_35] : memref<5x3xf32, #tpu.memory_space<smem>>
    %76 = vector.broadcast %75 : f32 to vector<8x128xf32>
    %77 = arith.mulf %76, %7 : vector<8x128xf32>
    %78 = arith.addf %74, %77 : vector<8x128xf32>
    %c3_36 = arith.constant 3 : index
    %79 = memref.load %arg3[%c3_36] : memref<5xf32, #tpu.memory_space<smem>>
    %80 = vector.broadcast %79 : f32 to vector<8x128xf32>
    %81 = arith.addf %78, %80 : vector<8x128xf32>
    %cst_37 = arith.constant 0.000000e+00 : f32
    %82 = vector.broadcast %cst_37 : f32 to vector<8x128xf32>
    %83 = arith.maximumf %81, %82 : vector<8x128xf32>
    %c127_i32_38 = arith.constant 127 : i32
    %84 = tpu.dynamic_rotate %83 by %c127_i32_38 dim 1 : vector<8x128xf32>, i32 -> vector<8x128xf32>
    %85 = arith.maximumf %83, %84 : vector<8x128xf32>
    %c1_i32_39 = arith.constant 1 : i32
    %86 = tpu.dynamic_rotate %85 by %c1_i32_39 dim 1 : vector<8x128xf32>, i32 -> vector<8x128xf32>
    %87 = arith.select %5, %67, %86 : vector<8x128xi1>, vector<8x128xf32>
    %c128 = arith.constant 128 : index
    %c0_40 = arith.constant 0 : index
    %88 = vector.load %arg4[%c128, %c0_40] : memref<384x30xf32, #tpu.memory_space<vmem>>, vector<128x30xf32>
    %cst_41 = arith.constant dense<0.000000e+00> : vector<8x30xf32>
    %89 = tpu.matmul %87, %88, %cst_41 {dimension_numbers = #tpu.dot_dimension_numbers<[1], [0], [0], [1], [0, 0, 1, 1], [], []>} : vector<8x128xf32>, vector<128x30xf32>, vector<8x30xf32> -> vector<8x30xf32>
    %90 = arith.addf %49, %89 : vector<8x30xf32>
    %c4 = arith.constant 4 : index
    %c0_42 = arith.constant 0 : index
    %91 = memref.load %arg2[%c4, %c0_42] : memref<5x3xf32, #tpu.memory_space<smem>>
    %92 = vector.broadcast %91 : f32 to vector<8x128xf32>
    %93 = arith.mulf %92, %6 : vector<8x128xf32>
    %c4_43 = arith.constant 4 : index
    %c1_44 = arith.constant 1 : index
    %94 = memref.load %arg2[%c4_43, %c1_44] : memref<5x3xf32, #tpu.memory_space<smem>>
    %95 = vector.broadcast %94 : f32 to vector<8x128xf32>
    %96 = arith.mulf %95, %0 : vector<8x128xf32>
    %97 = arith.addf %93, %96 : vector<8x128xf32>
    %c4_45 = arith.constant 4 : index
    %c2_46 = arith.constant 2 : index
    %98 = memref.load %arg2[%c4_45, %c2_46] : memref<5x3xf32, #tpu.memory_space<smem>>
    %99 = vector.broadcast %98 : f32 to vector<8x128xf32>
    %100 = arith.mulf %99, %7 : vector<8x128xf32>
    %101 = arith.addf %97, %100 : vector<8x128xf32>
    %c4_47 = arith.constant 4 : index
    %102 = memref.load %arg3[%c4_47] : memref<5xf32, #tpu.memory_space<smem>>
    %103 = vector.broadcast %102 : f32 to vector<8x128xf32>
    %104 = arith.addf %101, %103 : vector<8x128xf32>
    %cst_48 = arith.constant 0.000000e+00 : f32
    %105 = vector.broadcast %cst_48 : f32 to vector<8x128xf32>
    %106 = arith.maximumf %104, %105 : vector<8x128xf32>
    %c127_i32_49 = arith.constant 127 : i32
    %107 = tpu.dynamic_rotate %106 by %c127_i32_49 dim 1 : vector<8x128xf32>, i32 -> vector<8x128xf32>
    %108 = arith.maximumf %106, %107 : vector<8x128xf32>
    %c256 = arith.constant 256 : index
    %c0_50 = arith.constant 0 : index
    %109 = vector.load %arg4[%c256, %c0_50] : memref<384x30xf32, #tpu.memory_space<vmem>>, vector<128x30xf32>
    %cst_51 = arith.constant dense<0.000000e+00> : vector<8x30xf32>
    %110 = tpu.matmul %108, %109, %cst_51 {dimension_numbers = #tpu.dot_dimension_numbers<[1], [0], [0], [1], [0, 0, 1, 1], [], []>} : vector<8x128xf32>, vector<128x30xf32>, vector<8x30xf32> -> vector<8x30xf32>
    %111 = arith.addf %90, %110 : vector<8x30xf32>
    %c0_52 = arith.constant 0 : index
    %c0_53 = arith.constant 0 : index
    %112 = vector.load %arg5[%c0_52, %c0_53] : memref<1x30xf32, #tpu.memory_space<vmem>>, vector<1x30xf32>
    %113 = vector.broadcast %112 : vector<1x30xf32> to vector<8x30xf32>
    %114 = arith.addf %111, %113 : vector<8x30xf32>
    %cst_54 = arith.constant 0.000000e+00 : f32
    %115 = vector.broadcast %cst_54 : f32 to vector<8x30xf32>
    %116 = arith.maximumf %114, %115 : vector<8x30xf32>
    %c0_55 = arith.constant 0 : index
    %c0_56 = arith.constant 0 : index
    %117 = vector.load %arg6[%c0_55, %c0_56] : memref<30x3xf32, #tpu.memory_space<vmem>>, vector<30x3xf32>
    %cst_57 = arith.constant dense<0.000000e+00> : vector<8x3xf32>
    %118 = tpu.matmul %116, %117, %cst_57 {dimension_numbers = #tpu.dot_dimension_numbers<[1], [0], [0], [1], [0, 0, 1, 1], [], []>} : vector<8x30xf32>, vector<30x3xf32>, vector<8x3xf32> -> vector<8x3xf32>
    %c0_58 = arith.constant 0 : index
    %c0_59 = arith.constant 0 : index
    %119 = vector.load %arg7[%c0_58, %c0_59] : memref<1x3xf32, #tpu.memory_space<vmem>>, vector<1x3xf32>
    %120 = vector.broadcast %119 : vector<1x3xf32> to vector<8x3xf32>
    %121 = arith.addf %118, %120 : vector<8x3xf32>
    %c0_60 = arith.constant 0 : index
    %c0_61 = arith.constant 0 : index
    %122 = vector.load %arg8[%c0_60, %c0_61] : memref<8x3xf32, #tpu.memory_space<vmem>>, vector<8x3xf32>
    tpu.vector_store %arg8[%c0_60, %c0_61], %121 {strides = array<i32>} : memref<8x3xf32, #tpu.memory_space<vmem>>, vector<8x3xf32>,
    return
  }
  func.func @transform_0(%arg0: i32) -> (i32, i32) {
    %c0_i32 = arith.constant 0 : i32
    %c0_i32_0 = arith.constant 0 : i32
    return %arg0, %c0_i32 : i32, i32
  }
  func.func @transform_1(%arg0: i32) -> (i32, i32) {
    %c0_i32 = arith.constant 0 : i32
    %c0_i32_0 = arith.constant 0 : i32
    %c0_i32_1 = arith.constant 0 : i32
    return %c0_i32, %c0_i32_0 : i32, i32
  }
  func.func @transform_2(%arg0: i32) -> i32 {
    %c0_i32 = arith.constant 0 : i32
    %c0_i32_0 = arith.constant 0 : i32
    return %c0_i32 : i32
  }
  func.func @transform_3(%arg0: i32) -> (i32, i32) {
    %c0_i32 = arith.constant 0 : i32
    %c0_i32_0 = arith.constant 0 : i32
    %c0_i32_1 = arith.constant 0 : i32
    return %c0_i32, %c0_i32_0 : i32, i32
  }
  func.func @transform_4(%arg0: i32) -> (i32, i32) {
    %c0_i32 = arith.constant 0 : i32
    %c0_i32_0 = arith.constant 0 : i32
    %c0_i32_1 = arith.constant 0 : i32
    return %c0_i32, %c0_i32_0 : i32, i32
  }
  func.func @transform_5(%arg0: i32) -> (i32, i32) {
    %c0_i32 = arith.constant 0 : i32
    %c0_i32_0 = arith.constant 0 : i32
    %c0_i32_1 = arith.constant 0 : i32
    return %c0_i32, %c0_i32_0 : i32, i32
  }
  func.func @transform_6(%arg0: i32) -> (i32, i32) {
    %c0_i32 = arith.constant 0 : i32
    %c0_i32_0 = arith.constant 0 : i32
    %c0_i32_1 = arith.constant 0 : i32
    return %c0_i32, %c0_i32_0 : i32, i32
  }
  func.func @transform_7(%arg0: i32) -> (i32, i32) {
    %c0_i32 = arith.constant 0 : i32
    %c0_i32_0 = arith.constant 0 : i32
    return %arg0, %c0_i32 : i32, i32
  }
}

</mosaic_0001>

<bundles_post_ra>
// kernel: tpu_custom_call.1
= control target key start
LH: loop header
LB: loop body
LE: loop exit
PB: predicated region body
PF: predicated region fallthrough
CT: control target
= control target key end

     0   :  { %12 = vsyncpa [#allocation3], 0  ;;  %s1129_s0 = inlined_call_operand.vmem [shape: f32[8,128], index: 0, kind: input, shape index: {}]   ;;  %s1130_s1 = inlined_call_operand.vmem [shape: f32[5,3], index: 1, kind: input, shape index: {}]   ;;  %s1131_s2 = inlined_call_operand.vmem [shape: f32[5], index: 2, kind: input, shape index: {}]   ;;  %s1132_s3 = inlined_call_operand.vmem [shape: f32[384,30], index: 3, kind: input, shape index: {}]   ;;  %s1133_s4 = inlined_call_operand.vmem [shape: f32[1,30], index: 4, kind: input, shape index: {}]   ;;  %s1134_s5 = inlined_call_operand.vmem [shape: f32[30,3], index: 5, kind: input, shape index: {}]   ;;  %s1135_s6 = inlined_call_operand.vmem [shape: f32[1,3], index: 6, kind: input, shape index: {}]   ;;  %s1136_s7 = inlined_call_operand.vmem [shape: f32[8,3], index: 7, kind: output, shape index: {}]  }
   0x1   :  { %s22_s26 = sshll.u32 %s1130_s1, 4  ;;  %s23_s26 = int_to_ptr.vmem [resolvable:$true] %s22_s26 }
   0x2   :  { %13 = vsyncpa [#allocation5], 0  ;;  %s32_s29 = sshll.u32 %s1131_s2, 4  ;;  %s721_s30 = scalar_lea.vmem %s23_s26, 128  ;;  %s33_s29 = int_to_ptr.vmem [resolvable:$true] %s32_s29 }
   0x3   :  { %p722_p0 = scmp.ne.s32.totalorder %s23_s26, %s721_s30  ;;  %p726_p1 = scmp.lt.s32.totalorder %s23_s26, %s23_s26 }
   0x4   :  { %p727_p2 = scmp.lt.s32.totalorder %s721_s30, %s721_s30 }
   0x6   :  { %p728_p3 = por %p727_p2, %p726_p1 }
   0x8   :  { %p729_p4 = pnand %p728_p3, %p722_p0 }
   0xa   :  { %732 = shalt.err (!%p729_p4)
}
   0xb   :  { %s749_s8 = smov [#allocation2]   ;;  %s733_s9 = scalar_lea.vmem %s33_s29, 16 }
   0xc   :  { %25 = dma.vmem_to_smem %s23_s26, 128, %s749_s8, [#allocation3]  }
   0xd   :  { %p734_p5 = scmp.ne.s32.totalorder %s33_s29, %s733_s9  ;;  %p738_p6 = scmp.lt.s32.totalorder %s33_s29, %s33_s29 }
   0xe   :  { %p739_p7 = scmp.lt.s32.totalorder %s733_s9, %s733_s9 }
  0x10   :  { %p740_p8 = por %p739_p7, %p738_p6 }
  0x12   :  { %p741_p9 = pnand %p740_p8, %p734_p5 }
  0x14   :  { %744 = shalt.err (!%p741_p9)
}
  0x15   :  { %s750_s1 = smov [#allocation4]  }
  0x16   :  { %35 = dma.vmem_to_smem %s33_s29, 16, %s750_s1, [#allocation5]  }
  0x17   :  { %745 = dma.done.wait [#allocation3], 128  }
  0x18   :  { %746 = vsyncadd [#allocation3], 4294967168 }
  0x19   :  { %747 = dma.done.wait [#allocation5], 16  }
  0x1a   :  { %748 = vsyncadd [#allocation5], 4294967280 }
  0x1b   :  { %50 = sfence }
  0x1c   :  { %v51_v0 = vld [vmem:[%s1129_s0] sm:$0xff]  ;;  %s751_s11 = smov 1   ;;  %s752_s12 = smov 127   ;;  %v169_v46 = vld [vmem:[%s1132_s3 + $0xf8] sm:$0xff]  ;;  %v753_v49 = vmov 0.0   ;;  %v168_v50 = vld [vmem:[%s1132_s3 + $0xf0] sm:$0xff] }
  0x1d   :  { %56 = vrot.lane.b32.xlu0 %v51_v0, %s751_s11  ;;  %s806_s13 = sld [smem:[#allocation2]]  ;;  %599 = vmatprep.subr.mxu0 %v753_v49  ;;  %v114_v51 = vld [vmem:[%s1132_s3 + $0x78] sm:$0xff]  ;;  %v113_v57 = vld [vmem:[%s1132_s3 + $0x70] sm:$0xff]  ;;  %v167_v59 = vld [vmem:[%s1132_s3 + $0xe8] sm:$0xff]  ;;  %vm754_vm0 = vmmov 0   ;;  %vm439_vm2 = vcmask 1045504  }
  0x1e   :  { %s808_s14 = sld [smem:[#allocation2 + $0x80]]  ;;  %600 = vmatpush3.msra.mxu0 %v169_v46  ;;  %634 = vmatprep.subr.mxu1 %v753_v49  ;;  %v112_v60 = vld [vmem:[%s1132_s3 + $0x68] sm:$0xff]  ;;  %v340_v46 = vld [vmem:[%s1132_s3 + $0x160] sm:$0xff]  ;;  %vm435_vm3 = vcmask 244736   ;;  %vm513_vm4 = vcmask 23552  }
  0x1f   :  { %s810_s15 = sld [smem:[#allocation2 + $0x100]]  ;;  %601 = vmatprep.subr.mxu0 %v753_v49  ;;  %635 = vmatpush3.msra.mxu1 %v114_v51  ;;  %v336_v51 = vld [vmem:[%s1132_s3 + $0x140] sm:$0xff] }
  0x20   :  { %s812_s16 = sld [smem:[#allocation2 + $0x200]]  ;;  %602 = vmatpush3.msra.mxu0 %v168_v50  ;;  %636 = vmatprep.subr.mxu1 %v753_v49  ;;  %v337_v50 = vld [vmem:[%s1132_s3 + $0x148] sm:$0xff] }
  0x21   :  { %58 = vrot.lane.b32.xlu0 %v51_v0, %s752_s12  ;;  %s814_s17 = sld [smem:[#allocation2 + $0x180]]  ;;  %603 = vmatprep.subr.mxu0 %v753_v49 }
  0x22   :  { %s532_s18 = sld [smem:[#allocation2 + $0x181]]  ;;  %637 = vmatpush3.msra.mxu1 %v113_v57  ;;  %604 = vmatpush3.msra.mxu0 %v167_v59  ;;  %v330_v57 = vld [vmem:[%s1132_s3 + $0x110] sm:$0xff] }
  0x23   :  { %s528_s0 = sld [smem:[#allocation2 + $0x101]]  ;;  %v61_v5 = vstv %s806_s13  ;;  %638 = vmatprep.subr.mxu1 %v753_v49  ;;  %605 = vmatprep.subr.mxu0 %v753_v49 }
  0x24   :  { %s524_s19 = sld [smem:[#allocation2 + $0x81]]  ;;  %v79_v6 = vstv %s808_s14  ;;  %639 = vmatpush3.msra.mxu1 %v112_v60  ;;  %631 = vmatprep.mubr.msk.f32.mxu0 %vm754_vm0, %v753_v49  ;;  %v328_v60 = vld [vmem:[%s1132_s3 + $0x100] sm:$0xff] }
  0x25   :  { %s521_s20 = sld [smem:[#allocation2 + $0x1]]  ;;  %v116_v7 = vstv %s810_s15  ;;  %640 = vmatprep.subr.mxu1 %v753_v49  ;;  %666 = vmatprep.mubr.msk.f32.mxu1 %vm754_vm0, %v753_v49 }
  0x26   :  { %s816_s21 = sld [smem:[#allocation2 + $0x182]]  ;;  %v311_v8 = vstv %s812_s16 }
  0x27   :  { %s818_s22 = sld [smem:[#allocation2 + $0x102]]  ;;  %v134_v9 = vstv %s814_s17 }
  0x28   :  { %s820_s23 = sld [smem:[#allocation2 + $0x201]]  ;;  %v137_v1 = vstv %s532_s18 }
  0x29   :  { %s822_s24 = sld [smem:[#allocation2 + $0x82]]  ;;  %v119_v2 = vstv %s528_s0  ;;  %v138_v10 = vmul.f32 %v137_v1, %v51_v0  ;;  %v111_v1 = vld [vmem:[%s1132_s3 + $0x60] sm:$0xff] }
  0x2a   :  { %s824_s25 = sld [smem:[#allocation2 + $0x2]]  ;;  %v82_v3 = vstv %s524_s19  ;;  %v120_v12 = vmul.f32 %v119_v2, %v51_v0  ;;  %v165_v2 = vld [vmem:[%s1132_s3 + $0xd8] sm:$0xff]  ;;  %641 = vmatpush3.msra.mxu1 %v111_v1  ;;  %v424_v1 = vld [vmem:[%s1134_s5] sm:$0xff] }
  0x2b   :  { %s826_s26 = sld [smem:[#allocation2 + $0x202]]  ;;  %v64_v4 = vstv %s521_s20  ;;  %v83_v13 = vmul.f32 %v82_v3, %v51_v0  ;;  %642 = vmatprep.subr.mxu1 %v753_v49 }
  0x2c   :  { %s828_s27 = sld [smem:[#allocation4 + $0x3]]  ;;  %v65_v14 = vmul.f32 %v64_v4, %v51_v0  ;;  %v141_v19 = vstv %s816_s21  ;;  %v164_v4 = vld [vmem:[%s1132_s3 + $0xd0] sm:$0xff] }
  0x2d   :  { %s833_s28 = sld [smem:[#allocation4 + $0x2]]  ;;  %v123_v21 = vstv %s818_s22 }
  0x2e   :  { %s837_s29 = sld [smem:[#allocation4 + $0x1]]  ;;  %v314_v15 = vstv %s820_s23 }
  0x2f   :  { %s839_s30 = sld [smem:[#allocation4]]  ;;  %v86_v22 = vstv %s822_s24  ;;  %v315_v25 = vmul.f32 %v314_v15, %v51_v0  ;;  %v166_v0 = vld [vmem:[%s1132_s3 + $0xe0] sm:$0xff]  ;;  %v105_v15 = vld [vmem:[%s1132_s3 + $0x30] sm:$0xff] }
  0x30   :  { %v68_v23 = vstv %s824_s25  ;;  %s847_s8 = sld [smem:[#allocation4 + $0x4]]  ;;  %606 = vmatpush3.msra.mxu0 %v166_v0  ;;  %v426_v0 = vld [vmem:[%s1134_s5 + $0x10] sm:$0xff] }
  0x31   :  { %v318_v26 = vstv %s826_s26  ;;  %607 = vmatprep.subr.mxu0 %v753_v49 }
  0x32   :  { %v145_v36 = vstv %s828_s27  ;;  %608 = vmatpush3.msra.mxu0 %v165_v2 }
  0x33   :  { %v127_v37 = vstv %s833_s28  ;;  %609 = vmatprep.subr.mxu0 %v753_v49 }
  0x34   :  { %v90_v43 = vstv %s837_s29  ;;  %610 = vmatpush3.msra.mxu0 %v164_v4 }
  0x35   :  { %v72_v44 = vstv %s839_s30  ;;  %611 = vmatprep.subr.mxu0 %v753_v49 }
  0x36   :  { %v322_v58 = vstv %s847_s8 }
  0x8f   :  { %v57_v11 = vpop.permute.xlu0 %56 }
  0x90   :  { %v62_v16 = vmul.f32 %v61_v5, %v57_v11  ;;  %v80_v17 = vmul.f32 %v79_v6, %v57_v11  ;;  %v117_v18 = vmul.f32 %v116_v7, %v57_v11  ;;  %v135_v20 = vmul.f32 %v134_v9, %v57_v11  ;;  %v110_v5 = vld [vmem:[%s1132_s3 + $0x58] sm:$0xff]  ;;  %v163_v6 = vld [vmem:[%s1132_s3 + $0xc8] sm:$0xff]  ;;  %v109_v7 = vld [vmem:[%s1132_s3 + $0x50] sm:$0xff] }
  0x91   :  { %v312_v24 = vmul.f32 %v311_v8, %v57_v11  ;;  %643 = vmatpush3.msra.mxu1 %v110_v5  ;;  %v162_v8 = vld [vmem:[%s1132_s3 + $0xc0] sm:$0xff]  ;;  %v108_v9 = vld [vmem:[%s1132_s3 + $0x48] sm:$0xff]  ;;  %612 = vmatpush3.msra.mxu0 %v163_v6 }
  0x92   :  { %v139_v28 = vadd.f32 %v138_v10, %v135_v20  ;;  %v121_v29 = vadd.f32 %v120_v12, %v117_v18  ;;  %v84_v30 = vadd.f32 %v83_v13, %v80_v17  ;;  %v66_v31 = vadd.f32 %v65_v14, %v62_v16  ;;  %644 = vmatprep.subr.mxu1 %v753_v49  ;;  %v161_v10 = vld [vmem:[%s1132_s3 + $0xb8] sm:$0xff]  ;;  %v107_v11 = vld [vmem:[%s1132_s3 + $0x40] sm:$0xff]  ;;  %v160_v12 = vld [vmem:[%s1132_s3 + $0xb0] sm:$0xff] }
  0x93   :  { %v59_v27 = vpop.permute.xlu0 %58  ;;  %v316_v45 = vadd.f32 %v315_v25, %v312_v24  ;;  %645 = vmatpush3.msra.mxu1 %v109_v7  ;;  %613 = vmatprep.subr.mxu0 %v753_v49  ;;  %v106_v13 = vld [vmem:[%s1132_s3 + $0x38] sm:$0xff]  ;;  %v159_v14 = vld [vmem:[%s1132_s3 + $0xa8] sm:$0xff]  ;;  %v158_v16 = vld [vmem:[%s1132_s3 + $0xa0] sm:$0xff] }
  0x94   :  { %v142_v32 = vmul.f32 %v141_v19, %v59_v27  ;;  %v124_v33 = vmul.f32 %v123_v21, %v59_v27  ;;  %v87_v34 = vmul.f32 %v86_v22, %v59_v27  ;;  %v69_v35 = vmul.f32 %v68_v23, %v59_v27  ;;  %646 = vmatprep.subr.mxu1 %v753_v49  ;;  %v104_v17 = vld [vmem:[%s1132_s3 + $0x28] sm:$0xff]  ;;  %v157_v18 = vld [vmem:[%s1132_s3 + $0x98] sm:$0xff]  ;;  %v103_v19 = vld [vmem:[%s1132_s3 + $0x20] sm:$0xff] }
  0x95   :  { %v319_v38 = vmul.f32 %v318_v26, %v59_v27  ;;  %614 = vmatpush3.msra.mxu0 %v162_v8  ;;  %647 = vmatpush3.msra.mxu1 %v108_v9  ;;  %v156_v20 = vld [vmem:[%s1132_s3 + $0x90] sm:$0xff]  ;;  %v102_v21 = vld [vmem:[%s1132_s3 + $0x18] sm:$0xff]  ;;  %v155_v22 = vld [vmem:[%s1132_s3 + $0x88] sm:$0xff] }
  0x96   :  { %v143_v39 = vadd.f32 %v142_v32, %v139_v28  ;;  %v125_v40 = vadd.f32 %v124_v33, %v121_v29  ;;  %v88_v41 = vadd.f32 %v87_v34, %v84_v30  ;;  %v70_v42 = vadd.f32 %v69_v35, %v66_v31  ;;  %615 = vmatprep.subr.mxu0 %v753_v49  ;;  %v154_v23 = vld [vmem:[%s1132_s3 + $0x80] sm:$0xff]  ;;  %v101_v24 = vld [vmem:[%s1132_s3 + $0x10] sm:$0xff]  ;;  %v100_v25 = vld [vmem:[%s1132_s3 + $0x8] sm:$0xff] }
  0x97   :  { %v320_v52 = vadd.f32 %v319_v38, %v316_v45  ;;  %648 = vmatprep.subr.mxu1 %v753_v49  ;;  %616 = vmatpush3.msra.mxu0 %v161_v10  ;;  %v99_v26 = vld [vmem:[%s1132_s3] sm:$0xff]  ;;  %v52_v31 = vlaneseq }
  0x98   :  { %v856_v47 = vadd.f32 %v145_v36, %v143_v39  ;;  %v858_v48 = vadd.f32 %v127_v37, %v125_v40  ;;  %v870_v55 = vadd.f32 %v90_v43, %v88_v41  ;;  %v872_v56 = vadd.f32 %v72_v44, %v70_v42  ;;  %649 = vmatpush3.msra.mxu1 %v107_v11  ;;  %v343_v39 = vld [vmem:[%s1132_s3 + $0x178] sm:$0xff]  ;;  %v342_v41 = vld [vmem:[%s1132_s3 + $0x170] sm:$0xff]  ;;  %v341_v44 = vld [vmem:[%s1132_s3 + $0x168] sm:$0xff] }
  0x99   :  { %v895_v63 = vadd.f32 %v322_v58, %v320_v52  ;;  %617 = vmatprep.subr.mxu0 %v753_v49  ;;  %650 = vmatprep.subr.mxu1 %v753_v49  ;;  %v53_v32 = vand.u32 127, %v52_v31  ;;  %v335_v52 = vld [vmem:[%s1132_s3 + $0x138] sm:$0xff]  ;;  %v329_v58 = vld [vmem:[%s1132_s3 + $0x108] sm:$0xff]  ;;  %v539_v8 = vld [vmem:[%s1133_s4] ss:$0 sm:$0xff] }
  0x9a   :  { %v147_v53 = vmax.f32 %v856_v47, 0.0  ;;  %v129_v54 = vmax.f32 %v858_v48, 0.0  ;;  %v92_v61 = vmax.f32 %v870_v55, 0.0  ;;  %v74_v62 = vmax.f32 %v872_v56, 0.0  ;;  %618 = vmatpush3.msra.mxu0 %v160_v12  ;;  %651 = vmatpush3.msra.mxu1 %v106_v13  ;;  %v339_v47 = vld [vmem:[%s1132_s3 + $0x158] sm:$0xff]  ;;  %v338_v48 = vld [vmem:[%s1132_s3 + $0x150] sm:$0xff] }
  0x9b   :  { %v324_v3 = vmax.f32 %v895_v63, 0.0  ;;  %619 = vmatprep.subr.mxu0 %v753_v49  ;;  %652 = vmatprep.subr.mxu1 %v753_v49  ;;  %v54_v34 = vand.u32 1, %v53_v32  ;;  %v332_v55 = vld [vmem:[%s1132_s3 + $0x120] sm:$0xff]  ;;  %v331_v56 = vld [vmem:[%s1132_s3 + $0x118] sm:$0xff]  ;;  %v425_v63 = vld [vmem:[%s1134_s5 + $0x8] sm:$0xff] }
  0x9c   :  { %148 = vrot.lane.b32.xlu1 %v147_v53, %s752_s12  ;;  %130 = vrot.lane.b32.xlu0 %v129_v54, %s752_s12  ;;  %v540_v12 = vld [vmem:[%s1135_s6] ss:$0 sm:$0xff] }
  0x9d   :  { %620 = vmatpush3.msra.mxu0 %v159_v14  ;;  %653 = vmatpush3.msra.mxu1 %v105_v15  ;;  %vm1024_vm1 = vcmp.eq.s32.totalorder %v54_v34, 0 }
  0x9e   :  { %621 = vmatprep.subr.mxu0 %v753_v49  ;;  %654 = vmatprep.subr.mxu1 %v753_v49 }
  0x9f   :  { %622 = vmatpush3.msra.mxu0 %v158_v16  ;;  %655 = vmatpush3.msra.mxu1 %v104_v17 }
  0xa0   :  { %93 = vrot.lane.b32.xlu1 %v92_v61, %s752_s12  ;;  %75 = vrot.lane.b32.xlu0 %v74_v62, %s752_s12 }
  0xa1   :  { %623 = vmatprep.subr.mxu0 %v753_v49  ;;  %656 = vmatprep.subr.mxu1 %v753_v49 }
  0xa2   :  { %624 = vmatpush3.msra.mxu0 %v157_v18  ;;  %657 = vmatpush3.msra.mxu1 %v103_v19 }
  0xa3   :  { %625 = vmatprep.subr.mxu0 %v753_v49  ;;  %658 = vmatprep.subr.mxu1 %v753_v49 }
  0xa4   :  { %325 = vrot.lane.b32.xlu0 %v324_v3, %s752_s12  ;;  %626 = vmatpush3.msra.mxu0 %v156_v20 }
  0xa5   :  { %659 = vmatpush3.msra.mxu1 %v102_v21  ;;  %627 = vmatprep.subr.mxu0 %v753_v49 }
  0xa6   :  { %660 = vmatprep.subr.mxu1 %v753_v49  ;;  %628 = vmatpush3.msra.mxu0 %v155_v22 }
  0xa7   :  { %629 = vmatprep.subr.mxu0 %v753_v49  ;;  %661 = vmatpush3.msra.mxu1 %v101_v24 }
  0xa8   :  { %630 = vmatpush3.msra.mxu0 %v154_v23  ;;  %662 = vmatprep.subr.mxu1 %v753_v49 }
  0xa9   :  { %669 = vmatprep.subr.mxu0 %v753_v49  ;;  %663 = vmatpush3.msra.mxu1 %v100_v25 }
  0xaa   :  { %664 = vmatprep.subr.mxu1 %v753_v49 }
  0xab   :  { %665 = vmatpush3.msra.mxu1 %v99_v26 }
  0xac   :  { %704 = vmatprep.subr.mxu1 %v753_v49 }
 0x10e   :  { %v149_v27 = vpop.permute.xlu1 %148  ;;  %v131_v33 = vpop.permute.xlu0 %130 }
 0x10f   :  { %v150_v28 = vmax.f32 %v147_v53, %v149_v27  ;;  %v132_v36 = vmax.f32 %v129_v54, %v131_v33  ;;  %v334_v53 = vld [vmem:[%s1132_s3 + $0x130] sm:$0xff]  ;;  %v333_v54 = vld [vmem:[%s1132_s3 + $0x128] sm:$0xff] }
 0x111   :  { %151 = vrot.lane.b32.xlu1 %v150_v28, %s751_s11 }
 0x112   :  { %v94_v29 = vpop.permute.xlu1 %93  ;;  %v76_v37 = vpop.permute.xlu0 %75 }
 0x113   :  { %v95_v30 = vmax.f32 %v92_v61, %v94_v29  ;;  %v77_v42 = vmax.f32 %v74_v62, %v76_v37  ;;  %v427_v62 = vld [vmem:[%s1134_s5 + $0x18] sm:$0x3f] }
 0x115   :  { %96 = vrot.lane.b32.xlu1 %v95_v30, %s751_s11 }
 0x116   :  { %v326_v59 = vpop.permute.xlu0 %325 }
 0x117   :  { %v327_v61 = vmax.f32 %v324_v3, %v326_v59 }
 0x183   :  { %v152_v38 = vpop.permute.xlu1 %151 }
 0x184   :  { %v153_v40 = vsel %vm1024_vm1, %v132_v36, %v152_v38 }
 0x185   :  { %632 = vmatmul.mubr.f32.vlgmr.msra.gmra.mxu0 %v153_v40 }
 0x186   :  { %670 = vmatpush3.msra.mxu0 %v343_v39  ;;  %701 = vmatprep.mubr.msk.f32.mxu0 %vm754_vm0, %v753_v49 }
 0x187   :  { %671 = vmatprep.subr.mxu0 %v753_v49  ;;  %v97_v43 = vpop.permute.xlu1 %96 }
 0x188   :  { %672 = vmatpush3.msra.mxu0 %v342_v41  ;;  %v98_v45 = vsel %vm1024_vm1, %v77_v42, %v97_v43 }
 0x189   :  { %673 = vmatprep.subr.mxu0 %v753_v49  ;;  %667 = vmatmul.mubr.f32.vlgmr.msra.gmra.mxu1 %v98_v45 }
 0x18a   :  { %674 = vmatpush3.msra.mxu0 %v341_v44  ;;  %712 = vmatprep.mubr.msk.f32.mxu1 %vm754_vm0, %v753_v49 }
 0x18b   :  { %675 = vmatprep.subr.mxu0 %v753_v49  ;;  %705 = vmatpush3.msk.msra.mxu1 %vm439_vm2, %v427_v62 }
 0x18c   :  { %676 = vmatpush3.msra.mxu0 %v340_v46  ;;  %706 = vmatprep.subr.mxu1 %v753_v49 }
 0x18d   :  { %677 = vmatprep.subr.mxu0 %v753_v49  ;;  %707 = vmatpush3.msra.mxu1 %v426_v0 }
 0x18e   :  { %678 = vmatpush3.msra.mxu0 %v339_v47  ;;  %708 = vmatprep.subr.mxu1 %v753_v49 }
 0x18f   :  { %679 = vmatprep.subr.mxu0 %v753_v49  ;;  %709 = vmatpush3.msra.mxu1 %v425_v63 }
 0x190   :  { %680 = vmatpush3.msra.mxu0 %v338_v48  ;;  %710 = vmatprep.subr.mxu1 %v753_v49 }
 0x191   :  { %681 = vmatprep.subr.mxu0 %v753_v49  ;;  %711 = vmatpush3.msra.mxu1 %v424_v1 }
 0x192   :  { %682 = vmatpush3.msra.mxu0 %v337_v50 }
 0x193   :  { %683 = vmatprep.subr.mxu0 %v753_v49 }
 0x194   :  { %684 = vmatpush3.msra.mxu0 %v336_v51 }
 0x195   :  { %685 = vmatprep.subr.mxu0 %v753_v49 }
 0x196   :  { %686 = vmatpush3.msra.mxu0 %v335_v52 }
 0x197   :  { %687 = vmatprep.subr.mxu0 %v753_v49 }
 0x198   :  { %688 = vmatpush3.msra.mxu0 %v334_v53 }
 0x199   :  { %689 = vmatprep.subr.mxu0 %v753_v49 }
 0x19a   :  { %690 = vmatpush3.msra.mxu0 %v333_v54 }
 0x19b   :  { %691 = vmatprep.subr.mxu0 %v753_v49 }
 0x19c   :  { %692 = vmatpush3.msra.mxu0 %v332_v55 }
 0x19d   :  { %693 = vmatprep.subr.mxu0 %v753_v49 }
 0x19e   :  { %694 = vmatpush3.msra.mxu0 %v331_v56 }
 0x19f   :  { %695 = vmatprep.subr.mxu0 %v753_v49 }
 0x1a0   :  { %696 = vmatpush3.msra.mxu0 %v330_v57 }
 0x1a1   :  { %697 = vmatprep.subr.mxu0 %v753_v49 }
 0x1a2   :  { %698 = vmatpush3.msra.mxu0 %v329_v58 }
 0x1a3   :  { %699 = vmatprep.subr.mxu0 %v753_v49 }
 0x1a4   :  { %700 = vmatpush3.msra.mxu0 %v328_v60 }
 0x1a5   :  { %702 = vmatmul.mubr.f32.vlgmr.msra.gmra.mxu0 %v327_v61 }
 0x245   :  { %v236_v2 = vpop.f32.mrf.mxu0 }
 0x247   :  { %v633_v3 = vpop.f32.mrf.mxu0 }
 0x249   :  { %v306_v4 = vpop.f32.mrf.mxu1 }
 0x24a   :  { %v307_v6 = vadd.f32 %v306_v4, %v236_v2 }
 0x24b   :  { %v668_v5 = vpop.f32.mrf.mxu1 }
 0x265   :  { %v410_v7 = vpop.f32.mrf.mxu0 }
 0x266   :  { %v414_v9 = vadd.f32 %v410_v7, %v307_v6 }
 0x267   :  { %v703_v10 = vpop.f32.mrf.mxu0 }
 0x268   :  { %v422_v11 = vadd.f32 %v539_v8, %v414_v9 }
 0x26a   :  { %v423_v49 = vmax.f32 %v422_v11, 0.0 }
 0x26c   :  { %713 = vmatmul.mubr.msk.f32.vlgmr.msra.gmra.mxu1 %vm435_vm3, %v423_v49 }
 0x32c   :  { %v509_v13 = vpop.f32.mrf.mxu1 }
 0x32d   :  { %v510_v14 = vadd.f32 %v540_v12, %v509_v13 }
 0x32e   :  { %v714_v15 = vpop.f32.mrf.mxu1 }
 0x32f   :  { %514 = vst.msk [vmem:[%s1136_s7] sm:$0xff] %vm513_vm4, %v510_v14 }
 0x330   :  { %519 = vsyncpa [#allocation3], 1 }
 0x331   :  { %520 = vsyncpa [#allocation5], 1 }

</bundles_post_ra>
